<compile_context>
chip_gen: v6e
topology: v6e:2x2x1
jax: 0.10.0
libtpu: 0.0.40
codegen_flags: <defaults>
</compile_context>

<pallas_src>
import math
import functools

import numpy as np
import jax
import jax.numpy as jnp
from jax.experimental import pallas as pl
from jax.experimental.pallas import tpu as pltpu


def _pos_embed_kernel(t_ref, inv_ref, phase_ref, out_ref):
    # t_ref    : (1, tile_T, 1) f32   -- (normalized) cumulative position per time step
    # inv_ref  : (1, 1, F)      f32   -- 1 / dim_t            (static per call)
    # phase_ref: (1, 1, F)      f32   -- 0 for even feats, pi/2 for odd feats (cos->sin)
    # out_ref  : (1, tile_T, F) f32
    out_ref[...] = jnp.sin(t_ref[...] * inv_ref[...] + phase_ref[...])


def _pick_tile_t(T, max_tile=1024):
    """Largest time-tile that keeps double-buffered blocks well under scoped VMEM."""
    if T <= max_tile:
        return T
    # Prefer a divisor of T that is a multiple of 8 (clean (8,128)-aligned blocks).
    for cand in range(max_tile, 7, -1):
        if cand % 8 == 0 and T % cand == 0:
            return cand
    return max_tile  # non-dividing tile: Pallas masks the ragged edge block


def position_embedding_sine(x, mask, *, num_pos_feats=64, temperature=10000,
                            normalize=False, scale=None):
    """Pallas TPU implementation of PositionEmbeddingSine.forward(x, mask).

    mask: (B, T) bool (True = padded). Returns (B, T, num_pos_feats) float32.
    `x` is only used for device placement in the torch module; it is unused here.
    """
    del x
    if scale is not None and normalize is False:
        raise ValueError("normalize should be True if scale is passed")
    if scale is None:
        scale = 2 * math.pi

    B, T = mask.shape
    F = int(num_pos_feats)

    # --- host/XLA side: cumsum + optional normalize on the tiny (B, T) array ---------
    not_mask = jnp.logical_not(mask.astype(bool)).astype(jnp.float32)
    t_embed = jnp.cumsum(not_mask, axis=1)
    if normalize:
        eps = 1e-6
        t_embed = t_embed / (t_embed[:, -1:] + eps) * float(scale)
    t_embed = t_embed.reshape(B, T, 1)

    # --- trace-time constants (F and temperature are static) -------------------------
    dim_idx = np.arange(F, dtype=np.float64)
    dim_t = np.power(float(temperature), 2.0 * np.floor(dim_idx / 2.0) / float(F))
    inv_dim_t = jnp.asarray((1.0 / dim_t).astype(np.float32).reshape(1, 1, F))
    # even feature index -> sin(x), odd feature index -> cos(x) == sin(x + pi/2)
    phase = jnp.asarray(
        np.where(dim_idx % 2 == 1, np.pi / 2.0, 0.0).astype(np.float32).reshape(1, 1, F))

    tile_T = _pick_tile_t(T)
    grid = (B, pl.cdiv(T, tile_T))

    # TODO(synk): when F < 128 (e.g. the default 64), output stores are half-lane-width;
    # packing 128/F time steps per lane row would make stores fully lane-dense.
    return pl.pallas_call(
        _pos_embed_kernel,
        out_shape=jax.ShapeDtypeStruct((B, T, F), jnp.float32),
        grid=grid,
        in_specs=[
            pl.BlockSpec((1, tile_T, 1), lambda b, t: (b, t, 0)),
            pl.BlockSpec((1, 1, F), lambda b, t: (0, 0, 0)),
            pl.BlockSpec((1, 1, F), lambda b, t: (0, 0, 0)),
        ],
        out_specs=pl.BlockSpec((1, tile_T, F), lambda b, t: (b, t, 0)),
        compiler_params=pltpu.CompilerParams(
            dimension_semantics=("parallel", "parallel")),
    )(t_embed, inv_dim_t, phase)


def _reference(mask, num_pos_feats, temperature, normalize, scale):
    """Pure-JAX port of the torch forward, for a sanity check."""
    not_mask = jnp.logical_not(mask).astype(jnp.float32)
    t_embed = jnp.cumsum(not_mask, axis=1)
    if normalize:
        eps = 1e-6
        t_embed = t_embed / (t_embed[:, -1:] + eps) * scale
    dim_t = jnp.arange(num_pos_feats, dtype=jnp.float32)
    dim_t = temperature ** (2 * jnp.floor(dim_t / 2) / num_pos_feats)
    pos_t = t_embed[:, :, None] / dim_t
    pos = jnp.stack((jnp.sin(pos_t[:, :, 0::2]), jnp.cos(pos_t[:, :, 1::2])), axis=3)
    return pos.reshape(pos.shape[0], pos.shape[1], -1)


if __name__ == "__main__":
    B, T, C, F = 2, 8, 32, 32  # batch, temporal length, (unused) channels, num_pos_feats
    key = jax.random.PRNGKey(0)
    kx, _ = jax.random.split(key)

    x = jax.random.normal(kx, (B, T, C), dtype=jnp.float32)  # only used for device in torch
    mask = jnp.zeros((B, T), dtype=bool).at[1, 6:].set(True)  # last 2 frames of batch 1 padded

    # normalize=False path
    out = position_embedding_sine(x, mask, num_pos_feats=F, temperature=10000, normalize=False)
    out = jax.block_until_ready(out)
    ref = _reference(mask, F, 10000.0, False, 2 * math.pi)
    assert out.shape == (B, T, F), out.shape
    assert jnp.allclose(out, ref, atol=1e-5, rtol=1e-5), float(jnp.max(jnp.abs(out - ref)))

    # normalize=True path
    out_n = position_embedding_sine(x, mask, num_pos_feats=F, temperature=10000, normalize=True)
    out_n = jax.block_until_ready(out_n)
    ref_n = _reference(mask, F, 10000.0, True, 2 * math.pi)
    assert jnp.allclose(out_n, ref_n, atol=1e-5, rtol=1e-5), float(jnp.max(jnp.abs(out_n - ref_n)))

    print("KERNEL_OK")
</pallas_src>

<mosaic_0001>
module attributes {stable_mosaic.version = 11 : i64} {
  func.func @_pos_embed_kernel(%arg0: i32, %arg1: i32, %arg2: memref<1x8x1xf32, #tpu.memory_space<vmem>>, %arg3: memref<1x1x32xf32, #tpu.memory_space<vmem>>, %arg4: memref<1x1x32xf32, #tpu.memory_space<vmem>>, %arg5: memref<1x8x32xf32, #tpu.memory_space<vmem>>) attributes {dimension_semantics = [#tpu.dimension_semantics<parallel>, #tpu.dimension_semantics<parallel>], iteration_bounds = array<i64: 2, 1>, scalar_prefetch = 0 : i64, scratch_operands = 0 : i64, tpu.core_type = #tpu.core_type<tc>, window_params = [{transform_indices = @transform_0, window_bounds = array<i64: 1, 8, 1>}, {pipeline_mode = #tpu.pipeline_mode<synchronous>, transform_indices = @transform_1, window_bounds = array<i64: 1, 1, 32>}, {pipeline_mode = #tpu.pipeline_mode<synchronous>, transform_indices = @transform_2, window_bounds = array<i64: 1, 1, 32>}, {transform_indices = @transform_3, window_bounds = array<i64: 1, 8, 32>}]} {
    %c0 = arith.constant 0 : index
    %c0_0 = arith.constant 0 : index
    %c0_1 = arith.constant 0 : index
    %0 = vector.load %arg2[%c0, %c0_0, %c0_1] : memref<1x8x1xf32, #tpu.memory_space<vmem>>, vector<1x8x1xf32>
    %c0_2 = arith.constant 0 : index
    %c0_3 = arith.constant 0 : index
    %c0_4 = arith.constant 0 : index
    %1 = vector.load %arg3[%c0_2, %c0_3, %c0_4] : memref<1x1x32xf32, #tpu.memory_space<vmem>>, vector<1x1x32xf32>
    %2 = vector.broadcast %0 : vector<1x8x1xf32> to vector<1x8x32xf32>
    %3 = vector.broadcast %1 : vector<1x1x32xf32> to vector<1x8x32xf32>
    %4 = arith.mulf %2, %3 : vector<1x8x32xf32>
    %c0_5 = arith.constant 0 : index
    %c0_6 = arith.constant 0 : index
    %c0_7 = arith.constant 0 : index
    %5 = vector.load %arg4[%c0_5, %c0_6, %c0_7] : memref<1x1x32xf32, #tpu.memory_space<vmem>>, vector<1x1x32xf32>
    %6 = vector.broadcast %5 : vector<1x1x32xf32> to vector<1x8x32xf32>
    %7 = arith.addf %4, %6 : vector<1x8x32xf32>
    %8 = math.sin %7 : vector<1x8x32xf32>
    %c0_8 = arith.constant 0 : index
    %c0_9 = arith.constant 0 : index
    %c0_10 = arith.constant 0 : index
    %9 = vector.load %arg5[%c0_8, %c0_9, %c0_10] : memref<1x8x32xf32, #tpu.memory_space<vmem>>, vector<1x8x32xf32>
    tpu.vector_store %arg5[%c0_8, %c0_9, %c0_10], %8 {strides = array<i32>} : memref<1x8x32xf32, #tpu.memory_space<vmem>>, vector<1x8x32xf32>,
    return
  }
  func.func @transform_0(%arg0: i32, %arg1: i32) -> (i32, i32, i32) {
    %c0_i32 = arith.constant 0 : i32
    %c0_i32_0 = arith.constant 0 : i32
    return %arg0, %arg1, %c0_i32 : i32, i32, i32
  }
  func.func @transform_1(%arg0: i32, %arg1: i32) -> (i32, i32, i32) {
    %c0_i32 = arith.constant 0 : i32
    %c0_i32_0 = arith.constant 0 : i32
    %c0_i32_1 = arith.constant 0 : i32
    %c0_i32_2 = arith.constant 0 : i32
    return %c0_i32, %c0_i32_0, %c0_i32_1 : i32, i32, i32
  }
  func.func @transform_2(%arg0: i32, %arg1: i32) -> (i32, i32, i32) {
    %c0_i32 = arith.constant 0 : i32
    %c0_i32_0 = arith.constant 0 : i32
    %c0_i32_1 = arith.constant 0 : i32
    %c0_i32_2 = arith.constant 0 : i32
    return %c0_i32, %c0_i32_0, %c0_i32_1 : i32, i32, i32
  }
  func.func @transform_3(%arg0: i32, %arg1: i32) -> (i32, i32, i32) {
    %c0_i32 = arith.constant 0 : i32
    %c0_i32_0 = arith.constant 0 : i32
    return %arg0, %arg1, %c0_i32 : i32, i32, i32
  }
}

</mosaic_0001>

<bundles_post_ra>
// kernel: tpu_custom_call.1
= control target key start
LH: loop header
LB: loop body
LE: loop exit
PB: predicated region body
PF: predicated region fallthrough
CT: control target
= control target key end

     0   :  { %8 = vsyncpa [#allocation3], 0  ;;  %s731_s0 = inlined_call_operand.vmem [shape: f32[2,8,1], index: 0, kind: input, shape index: {}]   ;;  %s732_s1 = inlined_call_operand.vmem [shape: f32[1,1,32], index: 1, kind: input, shape index: {}]   ;;  %s733_s2 = inlined_call_operand.vmem [shape: f32[1,1,32], index: 2, kind: input, shape index: {}]   ;;  %s734_s3 = inlined_call_operand.hbm [shape: f32[2,8,32], index: 3, kind: output, shape index: {}]  }
   0x1   :  { %10 = vsyncpa [#allocation3 + $0x1], 0  ;;  %s599_s12 = smov 0   ;;  %s601_s13 = smov 0  }
   0x2   :  { %s603_s14 = smov 0   ;;  %s605_s15 = smov 0  }
   0x3   :  { %s607_s16 = smov 0   ;;  %s609_s17 = smov 0  }
   0x4 LB: > { %s405_s18 = sadd.s32 4294967295, %s569_s17   ;;  %s406_s19 = sadd.s32 4294967294, %s569_s17   ;;  %s569_s17 = sphi %s609_s17, %s16_s17   ;;  %s565_s16 = sphi %s607_s16, %s741_s16   ;;  %s561_s15 = sphi %s605_s15, %s740_s15   ;;  %s557_s14 = sphi %s603_s14, %s739_s14   ;;  %s553_s13 = sphi %s601_s13, %s738_s13   ;;  %s549_s12 = sphi %s599_s12, %s737_s12  }
   0x5   : > { %s28_s20 = sadd.s32 1, %s565_s16  ;;  %s107_s21 = sadd.s32 1, %s557_s14 }
   0x6   : > { %p30_p0 = scmp.ge.s32.totalorder %s28_s20, 2  ;;  %p117_p1 = scmp.ne.s32.totalorder %s557_s14, %s553_s13 }
   0x7   : > { %p118_p2 = scmp.eq.s32.totalorder %s405_s18, 1  ;;  %p123_p3 = scmp.ne.s32.totalorder %s553_s13, %s549_s12 }
   0x8   : > { %s743_s20 = smov (%p30_p0, %s28_s20), 0  ;;  %p124_p5 = scmp.eq.s32.totalorder %s406_s19, 1 }
   0x9   : > { %p639_p4 = por %p118_p2, %p117_p1  ;;  %s102_s23 = ssub.s32 %s565_s16, %s743_s20 }
   0xa   : > { %p409_p6 = scmp.ge.s32.totalorder %s569_s17, 1  ;;  %p105_p7 = scmp.eq.s32.totalorder %s102_s23, 0 }
   0xb   : > { %p646_p8 = por %p124_p5, %p123_p3  ;;  %p158_p9 = scmp.lt.s32.totalorder %s569_s17, 3 }
   0xc   : > { %s652_s25 = scalar_select %p105_p7, %s557_s14, %s107_s21  }
   0xd   : > { %p159_p10 = pnand %p409_p6, %p158_p9 }
   0xe   : > { %p184_p11 = scmp.lt.s32.totalorder (!%p159_p10), %s561_s15, 1  ;;  %s181_s8 = sand.u32 (!%p159_p10), 1, %s553_s13  }
   0xf   : > { %162 = sbr.rel (%p159_p10) target bundleno = 248 (0xf8), region = 32  ;;  %s410_s9 = sshll.u32 (!%p159_p10), %s181_s8, 3 }
  0x10   : > { %s419_s10 = sshll.u32 (!%p159_p10), %s561_s15, 7  ;;  %s183_s11 = scalar_lea.vmem (!%p159_p10), [#allocation2], %s410_s9 }
  0x11   : > { %s334_s18 = sshll.u32 (!%p159_p10), %s183_s11, 4  ;;  %s691_s23 = scalar_lea.hbm (!%p159_p10), %s734_s3, %s419_s10  ;;  %s335_s18 = int_to_ptr.vmem [resolvable:$true] %s334_s18 }
  0x14   : > { %v571_v0 = vmov 0   ;;  %s185_s26 = scalar_select %p184_p11, %s561_s15, 1  ;;  %v412_v2 = vld [vmem:[%s732_s1] ss:$0 sm:$0xff]  ;;  %v572_v17 = vmov 683565275  }
  0x15   : > { %488 = vset.pattern.permute.xlu0 %v571_v0  ;;  %v413_v3 = vld [vmem:[%s733_s2] ss:$0 sm:$0xff]  ;;  %v573_v19 = vmov 2475754826   ;;  %v574_v22 = vmov 2131351028  }
  0x16   : > { %s411_s27 = sshll.u32 %s185_s26, 3  ;;  %v575_v25 = vmov 2102212464   ;;  %v576_v28 = vmov 920167782   ;;  %vm317_vm12 = vcmask 261120  }
  0x17   : > { %s190_s30 = scalar_lea.vmem %s731_s0, %s411_s27  ;;  %v577_v31 = vmov 1326507024   ;;  %s320_s15 = scalar_lea.sflag [#allocation3], %s181_s8 }
  0x18   : > { %v191_v1 = vld [vmem:[%s190_s30] sm:$0xff]  ;;  %s493_s26 = scalar_lea.vmem %s335_s18, 128  ;;  %s578_s27 = smov [#allocation2]  }
  0x19   : > { %195 = vperm.xlu0 %488, %v191_v1   ;;  %p494_p12 = scmp.ne.s32.totalorder %s335_s18, %s493_s26  ;;  %s497_s28 = sshll.u32 %s578_s27, 4  ;;  %s498_s28 = int_to_ptr.vmem [resolvable:$false] %s497_s28 }
  0x1a   : > { %s499_s29 = scalar_lea.vmem %s498_s28, 256  ;;  %p500_p1 = scmp.lt.s32.totalorder %s335_s18, %s498_s28 }
  0x1b   : > { %p495_p13 = pnand %p494_p12, %p639_p4  ;;  %p501_p2 = scmp.lt.s32.totalorder %s499_s29, %s493_s26 }
  0x1d   : > { %p496_p0 = pneg %p495_p13  ;;  %p502_p3 = por %p501_p2, %p500_p1 }
  0x1f   : > { %p503_p5 = pnand %p502_p3, %p496_p0 }
  0x94   : > { %v196_v4 = vpop.permute.xlu0 %195 }
  0x95   : > { %v204_v5 = vmul.f32 %v412_v2, %v196_v4 }
  0x97   : > { %v665_v6 = vadd.f32 %v413_v3, %v204_v5 }
  0x99   : > { %v216_v7 = vand.u32 2139095040, %v665_v6  ;;  %v213_v11 = vand.u32 2147483647, %v665_v6  ;;  %vm215_vm7 = vcmp.lt.s32.totalorder %v665_v6, 0  ;;  %vm305_vm13 = vweird.f32 %v665_v6 }
  0x9b   : > { %v217_v8 = vshrl.u32 %v216_v7, 23  ;;  %v220_v14 = vand.u32 8388607, %v213_v11  ;;  %vm214_vm8 = vcmp.le.f32.partialorder %v213_v11, 0.7853982 }
  0x9d   : > { %v414_v9 = vadd.s32 4294967169, %v217_v8  ;;  %v221_v33 = vor.u32 8388608, %v220_v14 }
  0x9f   : > { %v223_v10 = vadd.s32 1, %v414_v9  ;;  %v261_v47 = vshll.u32 %v221_v33, 8 }
  0xa1   : > { %vm224_vm0 = vcmp.gt.s32.totalorder %v223_v10, 0 }
  0xa2   : > { %v225_v12 = vsel %vm224_vm0, %v223_v10, 0 }
  0xa3   : > { %v227_v13 = vand.u32 31, %v225_v12  ;;  %v226_v16 = vshrl.u32 %v225_v12, 5 }
  0xa5   : > { %v228_v15 = vsub.s32 32, %v227_v13  ;;  %v230_v18 = vshll.u32 %v572_v17, %v227_v13  ;;  %v233_v20 = vshll.u32 %v573_v19, %v227_v13  ;;  %v236_v24 = vshll.u32 %v574_v22, %v227_v13 }
  0xa6   : > { %v239_v27 = vshll.u32 %v575_v25, %v227_v13  ;;  %v242_v30 = vshll.u32 %v576_v28, %v227_v13  ;;  %vm245_vm1 = vcmp.lt.s32.totalorder %v226_v16, 1  ;;  %vm248_vm2 = vcmp.lt.s32.totalorder %v226_v16, 4 }
  0xa7   : > { %v231_v21 = vshrl.u32 %v573_v19, %v228_v15  ;;  %v234_v23 = vshrl.u32 %v574_v22, %v228_v15  ;;  %v237_v26 = vshrl.u32 %v575_v25, %v228_v15  ;;  %v240_v29 = vshrl.u32 %v576_v28, %v228_v15 }
  0xa8   : > { %v243_v32 = vshrl.u32 %v577_v31, %v228_v15  ;;  %v229_v42 = vshrl.u32 %v572_v17, %v228_v15  ;;  %vm247_vm3 = vcmp.lt.s32.totalorder %v226_v16, 3  ;;  %vm246_vm4 = vcmp.lt.s32.totalorder %v226_v16, 2 }
  0xa9   : > { %v232_v34 = vor.u32 %v231_v21, %v230_v18  ;;  %v235_v35 = vor.u32 %v234_v23, %v233_v20  ;;  %v238_v36 = vor.u32 %v237_v26, %v236_v24  ;;  %v241_v37 = vor.u32 %v240_v29, %v239_v27 }
  0xaa   : > { %v244_v38 = vor.u32 %v243_v32, %v242_v30 }
  0xab   : > { %v250_v39 = vsel %vm248_vm2, %v238_v36, 2102212464  ;;  %v253_v40 = vsel %vm245_vm1, %v232_v34, %v235_v35  ;;  %v257_v41 = vsel %vm245_vm1, %v235_v35, %v238_v36  ;;  %v254_v43 = vsel %vm248_vm2, %v241_v37, 920167782 }
  0xac   : > { %v258_v44 = vsel %vm248_vm2, %v244_v38, 1326507024  ;;  %v255_v45 = vsel %vm247_vm3, %v238_v36, %v254_v43  ;;  %v249_v48 = vsel %vm245_vm1, %v229_v42, %v232_v34  ;;  %v251_v49 = vsel %vm247_vm3, %v235_v35, %v250_v39 }
  0xad   : > { %v259_v46 = vsel %vm247_vm3, %v241_v37, %v258_v44  ;;  %v256_v50 = vsel %vm246_vm4, %v253_v40, %v255_v45  ;;  %v252_v56 = vsel %vm246_vm4, %v249_v48, %v251_v49 }
  0xae   : > { %v260_v51 = vsel %vm246_vm4, %v257_v41, %v259_v46  ;;  %v674_v54 = vmul.u32.u64.low %v261_v47, %v256_v50  ;;  %v675_v55 = vmul.u32.u64.high %v261_v47, %v256_v50, %v674_v54  ;;  %v268_v58 = vmul.u32 %v261_v47, %v252_v56 }
  0xaf   : > { %v671_v52 = vmul.u32.u64.low %v261_v47, %v260_v51  ;;  %v672_v53 = vmul.u32.u64.high %v261_v47, %v260_v51, %v671_v52 }
  0xb0   : > { %v271_v57 = vadd.s32 1, %v675_v55 }
  0xb1   : > { %vm270_vm5 = vc.u32 %v672_v53, %v674_v54  ;;  %v269_v7 = vadd.s32 %v674_v54, %v672_v53 }
  0xb2   : > { %v272_v59 = vsel %vm270_vm5, %v271_v57, %v675_v55 }
  0xb3   : > { %v273_v60 = vadd.s32 %v272_v59, %v268_v58 }
  0xb5   : > { %v274_v61 = vadd.s32 536870912, %v273_v60 }
  0xb7   : > { %v275_v62 = vshrl.u32 %v274_v61, 30 }
  0xb9   : > { %v276_v63 = vshll.u32 %v275_v62, 30  ;;  %v299_v21 = vsub.s32 4, %v275_v62 }
  0xbb   : > { %v277_v0 = vsub.s32 %v273_v60, %v276_v63  ;;  %v300_v24 = vsel %vm215_vm7, %v299_v21, %v275_v62 }
  0xbc   : > { %v302_v25 = vsel %vm214_vm8, 0, %v300_v24 }
  0xbd   : > { %v279_v1 = vsub.s32 0, %v277_v0  ;;  %v306_v26 = vadd.s32 3, %v302_v25 }
  0xbf   : > { %v415_v2 = vmin.u32 %v279_v1, %v277_v0  ;;  %v307_v27 = vand.u32 3, %v306_v26 }
  0xc1   : > { %v281_v3 = vclz %v415_v2  ;;  %vm312_vm9 = vcmp.eq.s32.totalorder %v307_v27, 2  ;;  %vm309_vm10 = vcmp.eq.s32.totalorder %v307_v27, 0  ;;  %vm308_vm11 = vcmp.lt.s32.totalorder %v307_v27, 2 }
  0xc3   : > { %v416_v4 = vadd.s32 4294967294, %v281_v3 }
  0xc5   : > { %vm417_vm6 = vcmp.lt.s32.totalorder %v416_v4, 0 }
  0xc6   : > { %v284_v5 = vsel %vm417_vm6, 0, %v416_v4 }
  0xc7   : > { %v285_v8 = vsub.s32 32, %v284_v5  ;;  %v289_v9 = vsub.s32 4294967266, %v284_v5  ;;  %v286_v10 = vshll.u32 %v277_v0, %v284_v5 }
  0xc9   : > { %v287_v12 = vshrl.u32 %v269_v7, %v285_v8  ;;  %v290_v13 = vadd.s32 127, %v289_v9 }
  0xcb   : > { %v288_v14 = vor.u32 %v287_v12, %v286_v10  ;;  %v291_v15 = vshll.u32 %v290_v13, 23 }
  0xcd   : > { %v292_v16 = vor.u32 4788187, %v291_v15  ;;  %v295_v18 = vcvt.s32.f32 %v288_v14 }
  0xcf   : > { %v293_v17 = vand.u32 2147483647, %v292_v16 }
  0xd1   : > { %v296_v19 = vmul.f32 %v295_v18, %v293_v17 }
  0xd3   : > { %v297_v20 = vxor.u32 2147483648, %v296_v19 }
  0xd5   : > { %v298_v22 = vsel %vm215_vm7, %v297_v20, %v296_v19 }
  0xd6   : > { %v301_v23 = vsel %vm214_vm8, %v665_v6, %v298_v22 }
  0xd7   : > { %489 = vcosq.f32 %v301_v23 }
  0xd8   : > { %491 = vsinq.f32 %v301_v23 }
  0xe4   : > { %v490_v28 = vpop.eup %489 }
  0xe5   : > { %v492_v29 = vpop.eup %491  ;;  %v313_v30 = vxor.u32 2147483648, %v490_v28 }
  0xe6   : > { %v310_v31 = vxor.u32 2147483648, %v492_v29 }
  0xe7   : > { %v314_v11 = vsel %vm312_vm9, %v313_v30, %v492_v29 }
  0xe8   : > { %v311_v32 = vsel %vm309_vm10, %v490_v28, %v310_v31 }
  0xe9   : > { %v315_v33 = vsel %vm308_vm11, %v311_v32, %v314_v11 }
  0xea   : > { %v316_v34 = vsel %vm305_vm13, nan, %v315_v33 }
  0xeb   : > { %318 = vst.msk [vmem:[%s183_s11] sm:$0xff] %vm317_vm12, %v316_v34 }
  0xec   : > { %506 = shalt.err (!%p503_p5)
}
  0xed   : > { %s507_s30 = scalar_lea.hbm %s691_s23, 128  ;;  %s511_s6 = scalar_lea.hbm %s734_s3, 256 }
  0xee   : > { %p508_p6 = scmp.ne.s32.totalorder %s691_s23, %s507_s30  ;;  %p512_p10 = scmp.lt.s32.totalorder %s691_s23, %s734_s3 }
  0xef   : > { %p513_p11 = scmp.lt.s32.totalorder %s511_s6, %s507_s30 }
  0xf0   : > { %p509_p7 = pnand %p508_p6, %p639_p4 }
  0xf1   : > { %p514_p12 = por %p513_p11, %p512_p10 }
  0xf2   : > { %p510_p9 = pneg %p509_p7 }
  0xf4   : > { %p515_p13 = pnand %p514_p12, %p510_p9 }
  0xf6   : > { %518 = shalt.err (!%p515_p13)
}
  0xf7   : > { %426 = dma.vmem_to_hbm [thread:$0]  (%p639_p4), %s335_s18, 128, %s691_s23, %s320_s15  }
  0xf8 PF: > { %p432_p0 = scmp.ge.s32.totalorder %s569_s17, 2  ;;  %s346_s9 = sand.u32 1, %s549_s12  }
  0xf9   : > { %s347_s10 = scalar_lea.sflag [#allocation3], %s346_s9 }
  0xfa   : > { %p429_p1 = pnand %p432_p0, %p646_p8 }
  0xfc   : > { %p430_p2 = pneg %p429_p1 }
  0xfe   : > { %544 = dma.done.wait (%p430_p2), %s347_s10, 128  }
  0xff   : > { %546 = vsyncadd (%p430_p2), %s347_s10, 4294967168  ;;  %s16_s17 = sadd.s32 1, %s569_s17   ;;  %s737_s12 = smov %s553_s13 }
 0x100   : > { %p13_p3 = scmp.ge.s32.totalorder %s16_s17, 4   ;;  %s738_s13 = smov %s557_s14 }
 0x101   : > { %s739_s14 = smov %s652_s25  ;;  %s740_s15 = smov %s565_s16 }
 0x102   : > { %s741_s16 = smov %s743_s20  ;;  %15 = sbr.rel (!%p13_p3) target bundleno = 4 (0x4), region = 67 }
 0x107   :  { %352 = vsyncpa [#allocation3], 1 }
 0x108   :  { %354 = vsyncpa [#allocation3 + $0x1], 1 }

</bundles_post_ra>
